<compile_context>
chip_gen: v6e
topology: v6e:2x2x1
jax: 0.10.0
libtpu: 0.0.40
codegen_flags: <defaults>
</compile_context>

<pallas_src>
import functools

import jax
import jax.numpy as jnp
from jax.experimental import pallas as pl
from jax.experimental.pallas import tpu as pltpu

_EPS = 1e-8


def _cosine_loss_kernel(x_ref, y_ref, o_ref, *, num_rows, num_cols,
                        block_n, block_hw, mask_n, mask_hw):
    # Blocks: (bt, C, thw) -> channel on sublanes, spatial on lanes.
    x = x_ref[...].astype(jnp.float32)
    y = y_ref[...].astype(jnp.float32)

    w12 = jnp.sum(x * y, axis=1, keepdims=True)   # (bt, 1, thw)
    w1 = jnp.sum(x * x, axis=1, keepdims=True)
    w2 = jnp.sum(y * y, axis=1, keepdims=True)

    inv = jax.lax.rsqrt(jnp.maximum(w1 * w2, jnp.float32(_EPS * _EPS)))
    contrib = 1.0 - w12 * inv                     # (bt, 1, thw)

    # Mask ragged batch / spatial tails (OOB block elements are undefined;
    # jnp.where is a select so any garbage/NaN never reaches the sum).
    if mask_n or mask_hw:
        valid = None
        if mask_n:
            row = (jax.lax.broadcasted_iota(jnp.int32, contrib.shape, 0)
                   + pl.program_id(0) * block_n)
            valid = row < num_rows
        if mask_hw:
            col = (jax.lax.broadcasted_iota(jnp.int32, contrib.shape, 2)
                   + pl.program_id(1) * block_hw)
            ok = col < num_cols
            valid = ok if valid is None else jnp.logical_and(valid, ok)
        contrib = jnp.where(valid, contrib, 0.0)

    partial = jnp.sum(contrib)
    # Lane-dense per-tile partial (scalar broadcast across 128 lanes);
    # the wrapper reads lane 0 of each tile and finishes the mean in JAX.
    o_ref[...] = jnp.full(o_ref.shape, partial, dtype=jnp.float32)


def _tpu_budgets():
    """Return (per-input tile budget bytes, scoped vmem_limit_bytes).

    Generation-aware with a safe conservative fallback:
      * 128 MiB-VMEM parts (v5e / v6e): 4 MiB tiles, 64 MiB scoped limit.
      * 64 MiB-VMEM parts (v7x-class) or unknown: 2 MiB tiles, 32 MiB limit.
    With Buffered(3) the worst-case input footprint is 2 x 3 x tile, which
    stays well inside the chosen limit on every generation.
    """
    phys_vmem = None
    try:
        info = pltpu.get_tpu_info()
        phys_vmem = getattr(info, "vmem_capacity_bytes", None)
    except Exception:
        phys_vmem = None
    if phys_vmem is None:
        try:
            kind = jax.devices()[0].device_kind.lower()
            if any(t in kind for t in ("v5 lite", "v5e", "v6")):
                phys_vmem = 128 * 1024 * 1024
        except Exception:
            pass
    if phys_vmem is not None and phys_vmem > 64 * 1024 * 1024:
        return 4 * 1024 * 1024, 64 * 1024 * 1024
    return 2 * 1024 * 1024, 32 * 1024 * 1024


def _choose_tiles(n, c, hw, itemsize, target_bytes):
    """Pick (batch_tile, spatial_tile) so one VMEM input block is ~target_bytes.

    Dtype-aware (sublane pad 8/16/32 for 4/2/1-byte elems, lane pad 128).
    Prefers thw == hw (one contiguous C*hw*itemsize HBM run per batch element)
    and only tiles the spatial/lane axis when a single (1, C, hw) block does
    not fit the budget; the channel dim always stays whole on sublanes.
    (For extremely large C (> ~16K f32) also raise the budget/limit.)
    """
    itemsize = max(int(itemsize), 1)
    pack = max(1, 4 // itemsize)               # elems packed per 32-bit sublane
    sub = 8 * pack                              # 8 f32 / 16 bf16 / 32 int8
    c_pad = -(-c // sub) * sub
    hw_pad = -(-hw // 128) * 128                # lane padding
    per_batch = c_pad * hw_pad * itemsize       # VMEM bytes of a (1, C, hw) block

    if per_batch <= target_bytes:
        thw = hw
        bt = max(1, min(n, target_bytes // max(per_batch, 1)))
    else:
        max_thw = max(128, (target_bytes // (c_pad * itemsize)) // 128 * 128)
        thw = min(hw, max_thw)                  # always a 128-multiple here
        bt = 1

    # Guarantee >= 2 grid tiles for non-trivial problems so both of v7x's
    # TensorCores get work (harmless single extra step on 1-TC parts).
    if bt >= n and thw >= hw and per_batch * n > (1 << 20):
        if n >= 2:
            bt = -(-n // 2)
        elif hw > 128:
            thw = max(128, (-(-(hw // 2) // 128)) * 128)
    return bt, thw


def cosine_loss(x, y, *, block_n=None, block_hw=None):
    """x, y: (N, C, *spatial) arrays of identical shape. Returns scalar f32.

    Do NOT pre-cast bf16 features to f32 before calling: the kernel casts in
    vregs, and bf16 inputs halve the HBM traffic of this bandwidth-bound loss.
    """
    assert x.shape == y.shape
    assert x.ndim >= 2
    n, c = x.shape[0], x.shape[1]
    hw = 1
    for d in x.shape[2:]:
        hw *= d
    hw = max(hw, 1)
    m = n * hw

    # Contiguous (free) reshape only — no transpose/astype/pad HBM copies.
    x3 = x.reshape(n, c, hw)
    y3 = y.reshape(n, c, hw)

    target_bytes, vmem_limit = _tpu_budgets()
    bt, thw = _choose_tiles(n, c, hw, x.dtype.itemsize, target_bytes)
    if block_n is not None:
        bt = max(1, min(block_n, n))
    if block_hw is not None:
        thw = min(block_hw, hw)
    assert thw == hw or thw % 128 == 0, "spatial tile must be full or 128-multiple"

    n_b = pl.cdiv(n, bt)
    n_hw = pl.cdiv(hw, thw)

    kernel = functools.partial(
        _cosine_loss_kernel,
        num_rows=n, num_cols=hw, block_n=bt, block_hw=thw,
        mask_n=(n % bt != 0), mask_hw=(hw % thw != 0),
    )

    # Deeper input buffering only pays off (and only matters) with >= 3 steps.
    idx_map = lambda b, t: (b, 0, t)
    if n_b * n_hw >= 3:
        in_specs = [
            pl.BlockSpec((bt, c, thw), idx_map, pipeline_mode=pl.Buffered(3)),
            pl.BlockSpec((bt, c, thw), idx_map, pipeline_mode=pl.Buffered(3)),
        ]
    else:
        in_specs = [
            pl.BlockSpec((bt, c, thw), idx_map),
            pl.BlockSpec((bt, c, thw), idx_map),
        ]

    partials = pl.pallas_call(
        kernel,
        out_shape=jax.ShapeDtypeStruct((n_b, n_hw, 1, 128), jnp.float32),
        grid_spec=pltpu.PrefetchScalarGridSpec(
            num_scalar_prefetch=0,
            grid=(n_b, n_hw),
            in_specs=in_specs,
            out_specs=pl.BlockSpec((1, 1, 1, 128), lambda b, t: (b, t, 0, 0)),
        ),
        compiler_params=pltpu.CompilerParams(
            dimension_semantics=("parallel", "parallel"),
            vmem_limit_bytes=vmem_limit,
        ),
    )(x3, y3)

    total = jnp.sum(partials[..., 0])     # one f32 partial per grid tile
    return total / jnp.float32(m)


def cosine_loss_ref(x, y):
    """Pure-JAX reference mirroring torch.nn.CosineSimilarity(dim=1)."""
    x = x.astype(jnp.float32)
    y = y.astype(jnp.float32)
    w12 = jnp.sum(x * y, axis=1)
    w1 = jnp.sum(x * x, axis=1)
    w2 = jnp.sum(y * y, axis=1)
    cos = w12 / jnp.sqrt(jnp.maximum(w1 * w2, _EPS * _EPS))
    return jnp.mean(1.0 - cos)


if __name__ == "__main__":
    key = jax.random.PRNGKey(0)
    k1, k2, k3, k4, k5, k6 = jax.random.split(key, 6)

    # Small NCHW shapes consistent with the module's forward.
    x = jax.random.normal(k1, (2, 4, 16, 16), dtype=jnp.float32)
    y = jax.random.normal(k2, (2, 4, 16, 16), dtype=jnp.float32)
    loss = jax.block_until_ready(cosine_loss(x, y))
    ref = jax.block_until_ready(cosine_loss_ref(x, y))
    assert jnp.allclose(loss, ref, atol=1e-5, rtol=1e-5), (loss, ref)

    # Ragged shapes + forced small blocks to exercise in-kernel masking and
    # the Buffered(3) multi-step pipeline path.
    x2 = jax.random.normal(k3, (3, 4, 10, 20), dtype=jnp.float32)
    y2 = jax.random.normal(k4, (3, 4, 10, 20), dtype=jnp.float32)
    loss2 = jax.block_until_ready(cosine_loss(x2, y2, block_n=2, block_hw=128))
    ref2 = jax.block_until_ready(cosine_loss_ref(x2, y2))
    assert jnp.allclose(loss2, ref2, atol=1e-5, rtol=1e-5), (loss2, ref2)

    # bf16 inputs (the recommended end-to-end dtype): kernel casts in vregs.
    x3 = jax.random.normal(k5, (2, 8, 16, 16), dtype=jnp.bfloat16)
    y3 = jax.random.normal(k6, (2, 8, 16, 16), dtype=jnp.bfloat16)
    loss3 = jax.block_until_ready(cosine_loss(x3, y3))
    ref3 = jax.block_until_ready(cosine_loss_ref(x3, y3))
    assert jnp.allclose(loss3, ref3, atol=1e-4, rtol=1e-4), (loss3, ref3)

    print("KERNEL_OK")
</pallas_src>

<mosaic_0001>
module attributes {stable_mosaic.version = 11 : i64} {
  func.func @_cosine_loss_kernel(%arg0: i32, %arg1: i32, %arg2: memref<2x4x256xf32, #tpu.memory_space<vmem>>, %arg3: memref<2x4x256xf32, #tpu.memory_space<vmem>>, %arg4: memref<1x1x1x128xf32, #tpu.memory_space<vmem>>) attributes {dimension_semantics = [#tpu.dimension_semantics<parallel>, #tpu.dimension_semantics<parallel>], iteration_bounds = array<i64: 1, 1>, scalar_prefetch = 0 : i64, scratch_operands = 0 : i64, tpu.core_type = #tpu.core_type<tc>, window_params = [{transform_indices = @transform_0, window_bounds = array<i64: 2, 4, 256>}, {transform_indices = @transform_1, window_bounds = array<i64: 2, 4, 256>}, {transform_indices = @transform_2, window_bounds = array<i64: 1, 1, 1, 128>}]} {
    %c0 = arith.constant 0 : index
    %c0_0 = arith.constant 0 : index
    %c0_1 = arith.constant 0 : index
    %0 = vector.load %arg2[%c0, %c0_0, %c0_1] : memref<2x4x256xf32, #tpu.memory_space<vmem>>, vector<2x4x256xf32>
    %c0_2 = arith.constant 0 : index
    %c0_3 = arith.constant 0 : index
    %c0_4 = arith.constant 0 : index
    %1 = vector.load %arg3[%c0_2, %c0_3, %c0_4] : memref<2x4x256xf32, #tpu.memory_space<vmem>>, vector<2x4x256xf32>
    %2 = arith.mulf %0, %1 : vector<2x4x256xf32>
    %cst = arith.constant dense<0.000000e+00> : vector<2x256xf32>
    %3 = vector.multi_reduction <add>, %2, %cst [1] : vector<2x4x256xf32> to vector<2x256xf32>
    %4 = vector.shape_cast %3 : vector<2x256xf32> to vector<2x1x256xf32>
    %5 = arith.mulf %0, %0 : vector<2x4x256xf32>
    %cst_5 = arith.constant dense<0.000000e+00> : vector<2x256xf32>
    %6 = vector.multi_reduction <add>, %5, %cst_5 [1] : vector<2x4x256xf32> to vector<2x256xf32>
    %7 = vector.shape_cast %6 : vector<2x256xf32> to vector<2x1x256xf32>
    %8 = arith.mulf %1, %1 : vector<2x4x256xf32>
    %cst_6 = arith.constant dense<0.000000e+00> : vector<2x256xf32>
    %9 = vector.multi_reduction <add>, %8, %cst_6 [1] : vector<2x4x256xf32> to vector<2x256xf32>
    %10 = vector.shape_cast %9 : vector<2x256xf32> to vector<2x1x256xf32>
    %11 = arith.mulf %7, %10 : vector<2x1x256xf32>
    %cst_7 = arith.constant 1.000000e-16 : f32
    %12 = vector.broadcast %cst_7 : f32 to vector<2x1x256xf32>
    %13 = arith.maximumf %11, %12 : vector<2x1x256xf32>
    %14 = math.rsqrt %13 : vector<2x1x256xf32>
    %15 = arith.mulf %4, %14 : vector<2x1x256xf32>
    %cst_8 = arith.constant 1.000000e+00 : f32
    %16 = vector.broadcast %cst_8 : f32 to vector<2x1x256xf32>
    %17 = arith.subf %16, %15 : vector<2x1x256xf32>
    %18 = vector.shape_cast %17 : vector<2x1x256xf32> to vector<1x2x1x256xf32>
    %cst_9 = arith.constant dense<0.000000e+00> : vector<1xf32>
    %19 = vector.multi_reduction <add>, %18, %cst_9 [1, 2, 3] : vector<1x2x1x256xf32> to vector<1xf32>
    %20 = vector.shape_cast %19 : vector<1xf32> to vector<1x1x1x1xf32>
    %21 = vector.extract %20[0, 0, 0, 0] : f32 from vector<1x1x1x1xf32>
    %22 = vector.broadcast %21 : f32 to vector<1x1x1x128xf32>
    %c0_10 = arith.constant 0 : index
    %c0_11 = arith.constant 0 : index
    %c0_12 = arith.constant 0 : index
    %c0_13 = arith.constant 0 : index
    %23 = vector.load %arg4[%c0_10, %c0_11, %c0_12, %c0_13] : memref<1x1x1x128xf32, #tpu.memory_space<vmem>>, vector<1x1x1x128xf32>
    tpu.vector_store %arg4[%c0_10, %c0_11, %c0_12, %c0_13], %22 {strides = array<i32>} : memref<1x1x1x128xf32, #tpu.memory_space<vmem>>, vector<1x1x1x128xf32>,
    return
  }
  func.func @transform_0(%arg0: i32, %arg1: i32) -> (i32, i32, i32) {
    %c0_i32 = arith.constant 0 : i32
    %c0_i32_0 = arith.constant 0 : i32
    return %arg0, %c0_i32, %arg1 : i32, i32, i32
  }
  func.func @transform_1(%arg0: i32, %arg1: i32) -> (i32, i32, i32) {
    %c0_i32 = arith.constant 0 : i32
    %c0_i32_0 = arith.constant 0 : i32
    return %arg0, %c0_i32, %arg1 : i32, i32, i32
  }
  func.func @transform_2(%arg0: i32, %arg1: i32) -> (i32, i32, i32, i32) {
    %c0_i32 = arith.constant 0 : i32
    %c0_i32_0 = arith.constant 0 : i32
    %c0_i32_1 = arith.constant 0 : i32
    return %arg0, %arg1, %c0_i32, %c0_i32_0 : i32, i32, i32, i32
  }
}

</mosaic_0001>

<bundles_post_ra>
// kernel: tpu_custom_call.1
= control target key start
LH: loop header
LB: loop body
LE: loop exit
PB: predicated region body
PF: predicated region fallthrough
CT: control target
= control target key end

     0   :  { %7 = vsyncpa [#allocation3], 0  ;;  %s330_s0 = inlined_call_operand.hbm [shape: f32[2,4,256], index: 0, kind: input, shape index: {}]   ;;  %s331_s1 = inlined_call_operand.hbm [shape: f32[2,4,256], index: 1, kind: input, shape index: {}]   ;;  %s332_s2 = inlined_call_operand.hbm [shape: f32[1,1,1,128], index: 2, kind: output, shape index: {}]  }
   0x1   :  { %8 = vsyncpa [#allocation6], 0 }
   0x2   :  { %9 = vsyncpa [#allocation4], 0  ;;  %s289_s9 = smov [#allocation2]  }
   0x3   :  { %s15_s10 = sshll.u32 %s289_s9, 4  ;;  %s16_s10 = int_to_ptr.vmem [resolvable:$true] %s15_s10 }
   0x4   :  { %s231_s11 = scalar_lea.vmem %s16_s10, 256  ;;  %p236_p1 = scmp.lt.s32.totalorder %s16_s10, %s16_s10 }
   0x5   :  { %p232_p0 = scmp.ne.s32.totalorder %s16_s10, %s231_s11  ;;  %p237_p2 = scmp.lt.s32.totalorder %s231_s11, %s231_s11 }
   0x7   :  { %p238_p3 = por %p237_p2, %p236_p1 }
   0x9   :  { %p239_p4 = pnand %p238_p3, %p232_p0 }
   0xb   :  { %242 = shalt.err (!%p239_p4)
}
   0xc   :  { %s290_s12 = smov 128   ;;  %s291_s13 = smov 8  }
   0xd   :  { %21 = dma.hbm_to_vmem [thread:$0]  %s330_s0, 256, %s16_s10, [#allocation3], %s290_s12, %s290_s12, %s291_s13  }
   0xe   :  { %s292_s16 = smov [#allocation5]  }
   0xf   :  { %s27_s17 = sshll.u32 %s292_s16, 4  ;;  %s28_s17 = int_to_ptr.vmem [resolvable:$true] %s27_s17 }
  0x10   :  { %s251_s18 = scalar_lea.vmem %s28_s17, 256  ;;  %p256_p6 = scmp.lt.s32.totalorder %s28_s17, %s28_s17 }
  0x11   :  { %p252_p5 = scmp.ne.s32.totalorder %s28_s17, %s251_s18  ;;  %p257_p7 = scmp.lt.s32.totalorder %s251_s18, %s251_s18 }
  0x13   :  { %p258_p8 = por %p257_p7, %p256_p6 }
  0x15   :  { %p259_p9 = pnand %p258_p8, %p252_p5 }
  0x17   :  { %262 = shalt.err (!%p259_p9)
}
  0x18   :  { %33 = dma.hbm_to_vmem [thread:$0]  %s331_s1, 256, %s28_s17, [#allocation6], %s290_s12, %s290_s12, %s291_s13  }
  0x19   :  { %283 = dma.done.wait [#allocation3], 256  }
  0x1a   :  { %284 = vsyncadd [#allocation3], 4294967040 }
  0x1b   :  { %285 = dma.done.wait [#allocation6], 256  }
  0x1c   :  { %286 = vsyncadd [#allocation6], 4294967040  ;;  %v40_v0 = vld [vmem:[#allocation2] sm:$0xff]  ;;  %v41_v1 = vld [vmem:[#allocation2 + $0x8] sm:$0xff]  ;;  %vm52_vm0 = vcmask 1043456   ;;  %vm173_vm1 = vcmask 1040384  }
  0x1d   :  { %v81_v2 = vmul.f32 %v40_v0, %v40_v0  ;;  %v82_v3 = vmul.f32 %v41_v1, %v41_v1  ;;  %v42_v12 = vld [vmem:[#allocation5] sm:$0xff]  ;;  %v43_v15 = vld [vmem:[#allocation5 + $0x8] sm:$0xff]  ;;  %s293_s0 = smov [#allocation7]  }
  0x1e   :  { %v44_v19 = vmul.f32 %v42_v12, %v40_v0  ;;  %v117_v20 = vmul.f32 %v42_v12, %v42_v12  ;;  %v45_v21 = vmul.f32 %v43_v15, %v41_v1  ;;  %v118_v24 = vmul.f32 %v43_v15, %v43_v15  ;;  %s198_s1 = sshll.u32 %s293_s0, 4  ;;  %s199_s1 = int_to_ptr.vmem [resolvable:$true] %s198_s1 }
  0x1f   :  { %v85_v4 = vcombine.high %v81_v2, %v81_v2  ;;  %v89_v5 = vsel %vm52_vm0, %v81_v2, 0.0  ;;  %v86_v6 = vcombine.high %v82_v3, %v82_v3  ;;  %v103_v10 = vsel %vm52_vm0, %v82_v3, 0.0  ;;  %s263_s22 = scalar_lea.vmem %s199_s1, 16  ;;  %s267_s23 = scalar_lea.vmem %s199_s1, 32 }
  0x20   :  { %v90_v7 = vrot.slane %v89_v5, 4  ;;  %v104_v11 = vrot.slane %v103_v10, 4  ;;  %v48_v27 = vcombine.high %v44_v19, %v44_v19  ;;  %v121_v29 = vcombine.high %v117_v20, %v117_v20  ;;  %p264_p10 = scmp.ne.s32.totalorder %s199_s1, %s263_s22  ;;  %p268_p11 = scmp.lt.s32.totalorder %s199_s1, %s199_s1 }
  0x21   :  { %v96_v8 = vsel %vm52_vm0, %v85_v4, 0.0  ;;  %v110_v14 = vsel %vm52_vm0, %v86_v6, 0.0  ;;  %v49_v30 = vcombine.high %v45_v21, %v45_v21  ;;  %v122_v32 = vcombine.high %v118_v24, %v118_v24  ;;  %p269_p12 = scmp.lt.s32.totalorder %s267_s23, %s263_s22 }
  0x22   :  { %v97_v9 = vrot.slane %v96_v8, 4  ;;  %v91_v13 = vadd.f32 %v90_v7, %v89_v5  ;;  %v105_v17 = vadd.f32 %v104_v11, %v103_v10  ;;  %v111_v18 = vrot.slane %v110_v14, 4 }
  0x23   :  { %v125_v33 = vsel %vm52_vm0, %v117_v20, 0.0  ;;  %v132_v36 = vsel %vm52_vm0, %v121_v29, 0.0  ;;  %v139_v37 = vsel %vm52_vm0, %v118_v24, 0.0  ;;  %v146_v41 = vsel %vm52_vm0, %v122_v32, 0.0  ;;  %p270_p13 = por %p269_p12, %p268_p11 }
  0x24   :  { %v98_v16 = vadd.f32 %v97_v9, %v96_v8  ;;  %v92_v22 = vrot.slane %v91_v13, 2  ;;  %v112_v23 = vadd.f32 %v111_v18, %v110_v14  ;;  %v106_v26 = vrot.slane %v105_v17, 2 }
  0x25   :  { %v126_v35 = vrot.slane %v125_v33, 4  ;;  %v133_v39 = vrot.slane %v132_v36, 4  ;;  %v140_v40 = vrot.slane %v139_v37, 4  ;;  %v53_v42 = vsel %vm52_vm0, %v44_v19, 0.0  ;;  %p271_p0 = pnand %p270_p13, %p264_p10 }
  0x26   :  { %v99_v25 = vrot.slane %v98_v16, 2  ;;  %v113_v28 = vrot.slane %v112_v23, 2  ;;  %v93_v31 = vadd.f32 %v92_v22, %v91_v13  ;;  %v107_v38 = vadd.f32 %v106_v26, %v105_v17 }
  0x27   :  { %v127_v44 = vadd.f32 %v126_v35, %v125_v33  ;;  %v147_v45 = vrot.slane %v146_v41, 4  ;;  %v60_v46 = vsel %vm52_vm0, %v48_v27, 0.0  ;;  %v67_v47 = vsel %vm52_vm0, %v45_v21, 0.0 }
  0x28   :  { %v100_v34 = vadd.f32 %v99_v25, %v98_v16  ;;  %v114_v43 = vadd.f32 %v113_v28, %v112_v23  ;;  %v134_v48 = vadd.f32 %v133_v39, %v132_v36  ;;  %v141_v49 = vadd.f32 %v140_v40, %v139_v37 }
  0x29   :  { %v74_v50 = vsel %vm52_vm0, %v49_v30, 0.0  ;;  %v94_v51 = vrot.slane %v93_v31, 1  ;;  %v128_v52 = vrot.slane %v127_v44, 2  ;;  %v148_v53 = vadd.f32 %v147_v45, %v146_v41 }
  0x2a   :  { %v101_v54 = vrot.slane %v100_v34, 1  ;;  %v108_v55 = vrot.slane %v107_v38, 1  ;;  %v135_v56 = vrot.slane %v134_v48, 2  ;;  %v142_v57 = vrot.slane %v141_v49, 2 }
  0x2b   :  { %v54_v58 = vrot.slane %v53_v42, 4  ;;  %v115_v59 = vrot.slane %v114_v43, 1  ;;  %v129_v60 = vadd.f32 %v128_v52, %v127_v44  ;;  %v149_v61 = vrot.slane %v148_v53, 2 }
  0x2c   :  { %v61_v62 = vrot.slane %v60_v46, 4  ;;  %v68_v63 = vrot.slane %v67_v47, 4  ;;  %v136_v0 = vadd.f32 %v135_v56, %v134_v48  ;;  %v143_v1 = vadd.f32 %v142_v57, %v141_v49 }
  0x2d   :  { %v75_v2 = vrot.slane %v74_v50, 4  ;;  %v95_v3 = vadd.f32 %v94_v51, %v93_v31  ;;  %v130_v4 = vrot.slane %v129_v60, 1  ;;  %v150_v5 = vadd.f32 %v149_v61, %v148_v53 }
  0x2e   :  { %v102_v6 = vadd.f32 %v101_v54, %v100_v34  ;;  %v109_v7 = vadd.f32 %v108_v55, %v107_v38  ;;  %v137_v8 = vrot.slane %v136_v0, 1  ;;  %v144_v9 = vrot.slane %v143_v1, 1 }
  0x2f   :  { %v55_v10 = vadd.f32 %v54_v58, %v53_v42  ;;  %v116_v11 = vadd.f32 %v115_v59, %v114_v43  ;;  %v131_v12 = vadd.f32 %v130_v4, %v129_v60  ;;  %v151_v13 = vrot.slane %v150_v5, 1 }
  0x30   :  { %v62_v14 = vadd.f32 %v61_v62, %v60_v46  ;;  %v138_v15 = vadd.f32 %v137_v8, %v136_v0  ;;  %v145_v16 = vadd.f32 %v144_v9, %v143_v1  ;;  %v69_v17 = vadd.f32 %v68_v63, %v67_v47 }
  0x31   :  { %v152_v18 = vadd.f32 %v151_v13, %v150_v5  ;;  %v153_v19 = vmul.f32 %v131_v12, %v95_v3  ;;  %v76_v20 = vadd.f32 %v75_v2, %v74_v50  ;;  %v56_v23 = vrot.slane %v55_v10, 2 }
  0x32   :  { %v154_v21 = vmul.f32 %v138_v15, %v102_v6  ;;  %v155_v22 = vmul.f32 %v145_v16, %v109_v7  ;;  %v63_v26 = vrot.slane %v62_v14, 2  ;;  %v70_v29 = vrot.slane %v69_v17, 2 }
  0x33   :  { %v156_v24 = vmul.f32 %v152_v18, %v116_v11  ;;  %v157_v25 = vmax.f32 %v153_v19, 1e-16  ;;  %v77_v31 = vrot.slane %v76_v20, 2  ;;  %v57_v32 = vadd.f32 %v56_v23, %v55_v10 }
  0x34   :  { %v158_v27 = vmax.f32 %v154_v21, 1e-16  ;;  %v159_v28 = vmax.f32 %v155_v22, 1e-16  ;;  %v64_v33 = vadd.f32 %v63_v26, %v62_v14  ;;  %v71_v34 = vadd.f32 %v70_v29, %v69_v17 }
  0x35   :  { %v160_v30 = vmax.f32 %v156_v24, 1e-16  ;;  %215 = vrsqrt.f32 %v157_v25  ;;  %v78_v35 = vadd.f32 %v77_v31, %v76_v20  ;;  %v58_v36 = vrot.slane %v57_v32, 1 }
  0x36   :  { %217 = vrsqrt.f32 %v158_v27  ;;  %v65_v37 = vrot.slane %v64_v33, 1  ;;  %v72_v38 = vrot.slane %v71_v34, 1 }
  0x37   :  { %219 = vrsqrt.f32 %v159_v28  ;;  %v79_v39 = vrot.slane %v78_v35, 1  ;;  %v59_v40 = vadd.f32 %v58_v36, %v57_v32 }
  0x38   :  { %221 = vrsqrt.f32 %v160_v30  ;;  %v66_v41 = vadd.f32 %v65_v37, %v64_v33  ;;  %v73_v42 = vadd.f32 %v72_v38, %v71_v34 }
  0x39   :  { %v80_v44 = vadd.f32 %v79_v39, %v78_v35 }
  0x42   :  { %v216_v43 = vpop.eup %215 }
  0x43   :  { %v218_v45 = vpop.eup %217  ;;  %v165_v46 = vmul.f32 %v216_v43, %v59_v40 }
  0x44   :  { %v220_v47 = vpop.eup %219  ;;  %v166_v48 = vmul.f32 %v218_v45, %v66_v41 }
  0x45   :  { %v222_v49 = vpop.eup %221  ;;  %v167_v50 = vmul.f32 %v220_v47, %v73_v42  ;;  %v169_v51 = vsub.f32 1.0, %v165_v46 }
  0x46   :  { %v168_v52 = vmul.f32 %v222_v49, %v80_v44  ;;  %v170_v53 = vsub.f32 1.0, %v166_v48 }
  0x47   :  { %v171_v54 = vsub.f32 1.0, %v167_v50  ;;  %v174_v55 = vsel %vm173_vm1, %v169_v51, 0.0 }
  0x48   :  { %v172_v56 = vsub.f32 1.0, %v168_v52  ;;  %v175_v57 = vsel %vm173_vm1, %v170_v53, 0.0 }
  0x49   :  { %v176_v58 = vadd.f32 %v175_v57, %v174_v55  ;;  %v177_v59 = vsel %vm173_vm1, %v171_v54, 0.0 }
  0x4a   :  { %v179_v60 = vsel %vm173_vm1, %v172_v56, 0.0 }
  0x4b   :  { %v178_v61 = vadd.f32 %v177_v59, %v176_v58 }
  0x4d   :  { %v180_v62 = vadd.f32 %v179_v60, %v178_v61 }
  0x4f   :  { %181 = vadd.xlane.f32.xlu0 %v180_v62 }
  0xd8   :  { %v182_v63 = vpop.xlane.xlu0 %181 }
  0xd9   :  { %v183_v0 = vrot.slane %v182_v63, 4 }
  0xdb   :  { %v184_v1 = vadd.f32 %v183_v0, %v182_v63 }
  0xdd   :  { %v185_v2 = vrot.slane %v184_v1, 2 }
  0xdf   :  { %v186_v3 = vadd.f32 %v185_v2, %v184_v1 }
  0xe1   :  { %v187_v4 = vrot.slane %v186_v3, 1 }
  0xe3   :  { %v188_v5 = vadd.f32 %v187_v4, %v186_v3 }
  0xe5   :  { %208 = vpush %v188_v5 }
 0x116   :  { %s209_s21 = spop %208 }
 0x117   :  { %v190_v6 = vstv %s209_s21 }
 0x118   :  { %191 = vst [vmem:[#allocation7] sm:$0x1] %v190_v6 }
 0x119   :  { %274 = shalt.err (!%p271_p0)
}
 0x11a   :  { %201 = dma.vmem_to_hbm [thread:$0]  %s199_s1, 16, %s332_s2, [#allocation4]  }
 0x11b   :  { %287 = dma.done.wait [#allocation4], 16  }
 0x11c   :  { %288 = vsyncadd [#allocation4], 4294967280 }
 0x11d   :  { %205 = vsyncpa [#allocation3], 1 }
 0x11e   :  { %206 = vsyncpa [#allocation6], 1 }
 0x11f   :  { %207 = vsyncpa [#allocation4], 1 }

</bundles_post_ra>
